<compile_context>
chip_gen: v6e
topology: v6e:2x2x1
jax: 0.10.0
libtpu: 0.0.40
codegen_flags: <defaults>
</compile_context>

<pallas_src>
import functools
import math

import jax
import jax.numpy as jnp
from jax.experimental import pallas as pl
from jax.experimental.pallas import tpu as pltpu

_LANE = 128
_SUBLANE = 8


def _cdiv(a, b):
    return (a + b - 1) // b


def _round_up(v, m):
    return ((v + m - 1) // m) * m


def _round_down(v, m):
    return (v // m) * m


# ----------------------------- kernels -----------------------------

def _pe_add_kernel(x_ref, pe_ref, o_ref):
    # Eval path: native-dtype streaming add; pe broadcasts over the row axis
    # when its block has fewer rows than the x block.
    o_ref[...] = x_ref[...] + pe_ref[...]


def _pe_add_mask_kernel(x_ref, pe_ref, m_ref, o_ref):
    # Train path (portable): m holds 0 or 1/(1-p) in x.dtype (inverted dropout).
    o_ref[...] = (x_ref[...] + pe_ref[...]) * m_ref[...]


def _pe_add_hwprng_kernel(seed_ref, x_ref, pe_ref, o_ref, *, dropout_p):
    # Optional TPU-only path: on-chip PRNG, integer-threshold compare, bits
    # generated directly at the block shape (no pad+slice temporaries).
    # TODO(synk): not exercised by default because prng_seed/prng_random_bits
    # have no CPU/interpret lowering; enable with use_hw_prng=True on real TPU.
    y = x_ref[...] + pe_ref[...]
    pltpu.prng_seed(seed_ref[0], pl.program_id(0), pl.program_id(1))
    bits = pltpu.bitcast(pltpu.prng_random_bits(y.shape), jnp.uint32)
    thresh = jnp.uint32(min(int(round(dropout_p * 2.0 ** 32)), 2 ** 32 - 1))
    scale = jnp.asarray(1.0 / (1.0 - dropout_p), y.dtype)
    o_ref[...] = jnp.where(bits >= thresh, y * scale, jnp.zeros_like(y))


# --------------------------- host helpers ---------------------------

def make_positional_encoding_table(max_len, d_model, dtype=jnp.float32):
    """Equivalent of the module's registered `pe` buffer, shape (max_len, d_model)."""
    assert d_model % 2 == 0, "d_model must be even (same assumption as the PyTorch module)"
    position = jnp.arange(max_len, dtype=jnp.float32)[:, None]
    div_term = jnp.exp(
        jnp.arange(0, d_model, 2, dtype=jnp.float32) * (-math.log(10000.0) / d_model))
    angles = position * div_term
    pe = jnp.zeros((max_len, d_model), jnp.float32)
    pe = pe.at[:, 0::2].set(jnp.sin(angles))
    pe = pe.at[:, 1::2].set(jnp.cos(angles))
    return pe.astype(dtype)


def make_dropout_mult(key, shape, dropout_p, dtype):
    """Inverted-dropout multiplier: 1/(1-p) where kept, 0 where dropped."""
    keep = jax.random.bernoulli(key, 1.0 - dropout_p, shape)
    scale = jnp.float32(1.0 / (1.0 - dropout_p))
    return jnp.where(keep, scale, jnp.float32(0.0)).astype(dtype)


def _device_budget():
    """(double-buffered working-set budget, vmem_limit_bytes) per generation."""
    kind = ""
    try:
        kind = jax.devices()[0].device_kind.lower()
    except Exception:
        pass
    if "v5" in kind or "v6" in kind:          # 128 MiB physical VMEM
        return 48 * (1 << 20), 96 * (1 << 20)
    # Conservative default: safe on v7x (64 MiB physical) and anything unknown.
    return 36 * (1 << 20), 56 * (1 << 20)


# ------------------------------ wrapper ------------------------------

def positional_encoding(x, pe, *, dropout_p=0.1, train=False, rng_key=None,
                        use_hw_prng=False, seed=0):
    """x: (batch, seq, d_model); pe: (max_len, d_model). Matches the module's forward."""
    B, S, D = x.shape
    assert S <= pe.shape[0] and D == pe.shape[1]
    dtype = x.dtype
    itemsize = jnp.dtype(dtype).itemsize
    pe_s = pe[:S].astype(dtype)                      # native dtype: no in-kernel upcast

    C = S * D
    apply_drop = bool(train) and float(dropout_p) > 0.0
    apply_hw = apply_drop and use_hw_prng
    apply_mask = apply_drop and not use_hw_prng

    # Sublane packing granularity: f32 -> 8 rows, bf16 -> 16, int8/fp8 -> 32.
    pack = _SUBLANE * max(1, 4 // itemsize)

    # ---------------- layout selection ----------------
    if B >= _SUBLANE or (C % pack) != 0:
        # Layout A: one row per batch element, (seq, d_model) flattened lane-dense;
        # pe is a single row broadcast over the batch (read once from HBM).
        rows, cols = B, C
        x2 = x.reshape(rows, cols)
        pe2 = pe_s.reshape(1, cols)
        tr = rows if rows <= 256 else 256            # row tile (full, or 256-row blocks)
    else:
        # Layout B (small batch): fold `pack` rows per example so every sublane is
        # used; pe is folded identically and aligns row-for-row with each block.
        rows, cols = B * pack, C // pack
        x2 = x.reshape(rows, cols)
        pe2 = pe_s.reshape(pack, cols)
        tr = pack                                    # exactly one example per row block

    mask2 = None
    if apply_mask:
        if rng_key is None:
            rng_key = jax.random.PRNGKey(seed)
        mask2 = make_dropout_mult(rng_key, (B, S, D), float(dropout_p), dtype).reshape(rows, cols)

    # ---------------- tile-size / VMEM budgeting (padding-aware) ----------------
    budget, vmem_limit = _device_budget()
    rows_pad = _round_up(tr, pack)                   # x / out / mask blocks
    pe_rows_pad = _round_up(pe2.shape[0], pack)      # a 1-row pe block still costs a full tile
    n_big = 2 + (1 if apply_mask else 0)             # x + out (+ mask)
    bytes_per_col = (n_big * rows_pad + pe_rows_pad) * itemsize * 2   # x2 for double-buffering
    tc = max(budget // bytes_per_col, _LANE)

    n_row_blocks = _cdiv(rows, tr)
    if tc >= cols:
        tc = cols
        # v7x has 2 TensorCores: avoid collapsing the parallel grid to one block.
        if n_row_blocks < 2 and cols > _LANE:
            tc_half = _round_up(_cdiv(cols, 2), _LANE)
            if tc_half < cols:
                tc = tc_half
    else:
        tc = _round_down(tc, _LANE)                  # lane-dense, unmasked stores
    n_col_blocks = _cdiv(cols, tc)

    # Column axis outer, row/batch axis inner: the pe block index is constant over
    # the inner loop, so its DMA is re-used instead of re-fetched per batch element.
    grid = (n_col_blocks, n_row_blocks)

    def _xy_map(j, i, *_):
        return (i, j)

    def _pe_map(j, i, *_):
        return (0, j)

    x_spec = pl.BlockSpec((tr, tc), _xy_map)
    pe_spec = pl.BlockSpec((pe2.shape[0], tc), _pe_map)
    out_spec = pl.BlockSpec((tr, tc), _xy_map)
    out_shape = jax.ShapeDtypeStruct((rows, cols), dtype)

    cparams = pltpu.CompilerParams(
        dimension_semantics=("parallel", "parallel"),
        vmem_limit_bytes=int(vmem_limit),
    )

    if apply_hw:
        kernel = functools.partial(_pe_add_hwprng_kernel, dropout_p=float(dropout_p))
        grid_spec = pltpu.PrefetchScalarGridSpec(
            num_scalar_prefetch=1, grid=grid,
            in_specs=[x_spec, pe_spec], out_specs=out_spec)
        out = pl.pallas_call(kernel, out_shape=out_shape, grid_spec=grid_spec,
                             compiler_params=cparams)(
            jnp.asarray([seed], jnp.int32), x2, pe2)
    elif apply_mask:
        grid_spec = pltpu.PrefetchScalarGridSpec(
            num_scalar_prefetch=0, grid=grid,
            in_specs=[x_spec, pe_spec, x_spec], out_specs=out_spec)
        out = pl.pallas_call(_pe_add_mask_kernel, out_shape=out_shape, grid_spec=grid_spec,
                             compiler_params=cparams)(x2, pe2, mask2)
    else:
        grid_spec = pltpu.PrefetchScalarGridSpec(
            num_scalar_prefetch=0, grid=grid,
            in_specs=[x_spec, pe_spec], out_specs=out_spec)
        out = pl.pallas_call(_pe_add_kernel, out_shape=out_shape, grid_spec=grid_spec,
                             compiler_params=cparams)(x2, pe2)

    return out.reshape(B, S, D)


def positional_encoding_ref(x, pe):
    S = x.shape[1]
    return x + pe[:S].astype(x.dtype)[None, :, :]


# ------------------------------ self-test ------------------------------

if __name__ == "__main__":
    key = jax.random.PRNGKey(0)
    max_len = 5000
    d_model = 32
    dropout_p = 0.1
    pe = make_positional_encoding_table(max_len, d_model)

    # 1) Eval, small batch (B < 8 -> folded-row layout).
    x_small = jax.random.normal(key, (2, 8, d_model), dtype=jnp.float32)
    out = jax.block_until_ready(positional_encoding(x_small, pe, dropout_p=dropout_p, train=False))
    assert out.shape == x_small.shape
    assert jnp.allclose(out, positional_encoding_ref(x_small, pe), atol=1e-6, rtol=1e-6), \
        "eval mismatch (small batch)"

    # 2) Eval, B >= 8 (broadcast-pe layout).
    x_big = jax.random.normal(jax.random.PRNGKey(1), (8, 16, d_model), dtype=jnp.float32)
    out_big = jax.block_until_ready(positional_encoding(x_big, pe, train=False))
    assert jnp.allclose(out_big, positional_encoding_ref(x_big, pe), atol=1e-6, rtol=1e-6), \
        "eval mismatch (B >= 8)"

    # 3) Eval, awkward shape (C not divisible by packing -> full-dim fallback blocks).
    pe6 = make_positional_encoding_table(64, 6)
    x_odd = jax.random.normal(jax.random.PRNGKey(2), (3, 5, 6), dtype=jnp.float32)
    out_odd = jax.block_until_ready(positional_encoding(x_odd, pe6, train=False))
    assert jnp.allclose(out_odd, positional_encoding_ref(x_odd, pe6), atol=1e-6, rtol=1e-6), \
        "eval mismatch (odd shape)"

    # 4) Train mode (host-generated inverted-dropout mask) -- deterministic, exact check.
    kdrop = jax.random.PRNGKey(123)
    out_tr = jax.block_until_ready(
        positional_encoding(x_small, pe, dropout_p=dropout_p, train=True, rng_key=kdrop))
    mult = make_dropout_mult(kdrop, x_small.shape, dropout_p, x_small.dtype)
    ref_tr = positional_encoding_ref(x_small, pe) * mult
    assert jnp.allclose(out_tr, ref_tr, atol=1e-6, rtol=1e-6), "train mismatch"

    # 5) bfloat16 eval (native-dtype compute path).
    x_bf = x_small.astype(jnp.bfloat16)
    out_bf = jax.block_until_ready(positional_encoding(x_bf, pe, train=False))
    ref_bf = x_bf + pe[:8].astype(jnp.bfloat16)[None, :, :]
    assert out_bf.dtype == jnp.bfloat16
    assert jnp.allclose(out_bf.astype(jnp.float32), ref_bf.astype(jnp.float32),
                        atol=2e-2, rtol=2e-2), "eval mismatch (bf16)"

    print("KERNEL_OK")
</pallas_src>

<mosaic_0001>
module attributes {stable_mosaic.version = 11 : i64} {
  func.func @_pe_add_kernel(%arg0: i32, %arg1: i32, %arg2: memref<8x32xf32, #tpu.memory_space<vmem>>, %arg3: memref<8x32xf32, #tpu.memory_space<vmem>>, %arg4: memref<8x32xf32, #tpu.memory_space<vmem>>) attributes {dimension_semantics = [#tpu.dimension_semantics<parallel>, #tpu.dimension_semantics<parallel>], iteration_bounds = array<i64: 1, 2>, scalar_prefetch = 0 : i64, scratch_operands = 0 : i64, tpu.core_type = #tpu.core_type<tc>, window_params = [{transform_indices = @transform_0, window_bounds = array<i64: 8, 32>}, {transform_indices = @transform_1, window_bounds = array<i64: 8, 32>}, {transform_indices = @transform_2, window_bounds = array<i64: 8, 32>}]} {
    %c0 = arith.constant 0 : index
    %c0_0 = arith.constant 0 : index
    %0 = vector.load %arg2[%c0, %c0_0] : memref<8x32xf32, #tpu.memory_space<vmem>>, vector<8x32xf32>
    %c0_1 = arith.constant 0 : index
    %c0_2 = arith.constant 0 : index
    %1 = vector.load %arg3[%c0_1, %c0_2] : memref<8x32xf32, #tpu.memory_space<vmem>>, vector<8x32xf32>
    %2 = arith.addf %0, %1 : vector<8x32xf32>
    %c0_3 = arith.constant 0 : index
    %c0_4 = arith.constant 0 : index
    %3 = vector.load %arg4[%c0_3, %c0_4] : memref<8x32xf32, #tpu.memory_space<vmem>>, vector<8x32xf32>
    tpu.vector_store %arg4[%c0_3, %c0_4], %2 {strides = array<i32>} : memref<8x32xf32, #tpu.memory_space<vmem>>, vector<8x32xf32>,
    return
  }
  func.func @transform_0(%arg0: i32, %arg1: i32) -> (i32, i32) {
    %c0_i32 = arith.constant 0 : i32
    return %arg1, %arg0 : i32, i32
  }
  func.func @transform_1(%arg0: i32, %arg1: i32) -> (i32, i32) {
    %c0_i32 = arith.constant 0 : i32
    %c0_i32_0 = arith.constant 0 : i32
    return %c0_i32, %arg0 : i32, i32
  }
  func.func @transform_2(%arg0: i32, %arg1: i32) -> (i32, i32) {
    %c0_i32 = arith.constant 0 : i32
    return %arg1, %arg0 : i32, i32
  }
}

</mosaic_0001>

<bundles_post_ra>
// kernel: tpu_custom_call.1
= control target key start
LH: loop header
LB: loop body
LE: loop exit
PB: predicated region body
PF: predicated region fallthrough
CT: control target
= control target key end

     0   :  { %7 = vsyncpa [#allocation3], 0  ;;  %s715_s0 = inlined_call_operand.hbm [shape: f32[16,32], index: 0, kind: input, shape index: {}]   ;;  %s716_s1 = inlined_call_operand.hbm [shape: f32[8,32], index: 1, kind: input, shape index: {}]   ;;  %s717_s2 = inlined_call_operand.hbm [shape: f32[16,32], index: 2, kind: output, shape index: {}]  }
   0x1   :  { %9 = vsyncpa [#allocation3 + $0x1], 0 }
   0x2   :  { %10 = vsyncpa [#allocation6], 0 }
   0x3   :  { %11 = vsyncpa [#allocation4], 0 }
   0x4   :  { %13 = vsyncpa [#allocation4 + $0x1], 0  ;;  %s554_s9 = smov 0   ;;  %s556_s10 = smov 0  }
   0x5   :  { %s558_s11 = smov 0   ;;  %s560_s12 = smov 0  }
   0x6   :  { %s562_s13 = smov 0   ;;  %s564_s14 = smov 0  }
   0x7 LB: > { %s308_s15 = sadd.s32 4294967295, %s534_s14   ;;  %s309_s16 = sadd.s32 4294967294, %s534_s14   ;;  %s534_s14 = sphi %s564_s14, %s19_s14   ;;  %s530_s13 = sphi %s562_s13, %s734_s13   ;;  %s526_s12 = sphi %s560_s12, %s733_s12   ;;  %s522_s11 = sphi %s558_s11, %s732_s11   ;;  %s518_s10 = sphi %s556_s10, %s731_s10   ;;  %s514_s9 = sphi %s554_s9, %s730_s9  }
   0x8   : > { %p53_p0 = scmp.ne.s32.totalorder %s518_s10, %s514_s9  ;;  %p588_p1 = scmp.eq.s32.totalorder %s308_s15, 0 }
   0x9   : > { %p592_p2 = scmp.eq.s32.totalorder %s308_s15, 1  ;;  %p111_p3 = scmp.eq.s32.totalorder %s309_s16, 1 }
   0xa   : > { %p598_p4 = por %p588_p1, %p53_p0  ;;  %p310_p5 = scmp.ge.s32.totalorder %s534_s14, 1 }
   0xb   : > { %p603_p6 = por %p111_p3, %p53_p0  ;;  %p118_p7 = scmp.lt.s32.totalorder %s534_s14, 3 }
   0xc   : > { %s721_s19 = scalar_select %p598_p4, 1, 0 }
   0xd   : > { %s722_s20 = scalar_select %p603_p6, 1, 0 }
   0xe   : > { %p608_p8 = pnand %p310_p5, %p118_p7  ;;  %s536_s22 = smov [#allocation5]  }
   0xf   : > { %s133_s23 = sshll.u32 %s536_s22, 4  ;;  %s28_s25 = sadd.s32 1, %s530_s13  ;;  %s134_s23 = int_to_ptr.vmem [resolvable:$true] %s133_s23 }
  0x10   : > { %p331_p10 = pneg %p608_p8  ;;  %s40_s26 = sadd.s32 1, %s522_s11 }
  0x11   : > { %p29_p12 = scmp.ge.s32.totalorder %s28_s25, 2  ;;  %s407_s27 = scalar_lea.vmem %s134_s23, 128 }
  0x12   : > { %p617_p11 = pnand %p331_p10, %p588_p1  ;;  %p408_p0 = scmp.ne.s32.totalorder %s134_s23, %s407_s27 }
  0x13   : > { %p415_p7 = scmp.lt.s32.totalorder %s134_s23, %s134_s23  ;;  %p416_p6 = scmp.lt.s32.totalorder %s407_s27, %s407_s27 }
  0x14   : > { %p398_p13 = pneg %p617_p11 }
  0x15   : > { %p417_p9 = por %p416_p6, %p415_p7 }
  0x16   : > { %p410_p3 = pnand %p408_p0, %p398_p13 }
  0x18   : > { %p411_p5 = pneg %p410_p3 }
  0x1a   : > { %p418_p4 = pnand %p417_p9, %p411_p5 }
  0x1c   : > { %421 = shalt.err (!%p418_p4)
}
  0x1d   : > { %334 = dma.hbm_to_vmem [thread:$0]  (!%p617_p11), %s716_s1, 128, %s134_s23, [#allocation6]  }
  0x1e   : > { %s736_s25 = smov (%p29_p12, %s28_s25), 0  ;;  %p47_p6 = scmp.ne.s32.totalorder %s522_s11, %s518_s10 }
  0x1f   : > { %p48_p4 = scmp.eq.s32.totalorder %s534_s14, 0  ;;  %s35_s30 = ssub.s32 %s530_s13, %s736_s25 }
  0x20   : > { %p344_p9 = scmp.lt.s32.totalorder %s534_s14, 2  ;;  %p38_p10 = scmp.eq.s32.totalorder %s35_s30, 0 }
  0x21   : > { %p49_p13 = por %p48_p4, %p47_p6  ;;  %p640_p0 = por %p592_p2, %p47_p6 }
  0x22   : > { %s144_s4 = sand.u32 1, %s522_s11   ;;  %s314_s7 = sshll.u32 %s530_s13, 7 }
  0x23   : > { %s646_s5 = scalar_select %p38_p10, %s522_s11, %s40_s26  }
  0x24   : > { %s313_s6 = sshll.u32 %s144_s4, 3  ;;  %s154_s16 = scalar_lea.hbm %s715_s0, %s314_s7 }
  0x25   : > { %s148_s22 = scalar_lea.vmem [#allocation2], %s313_s6  ;;  %p652_p11 = pnand %p344_p9, %p49_p13 }
  0x26   : > { %s156_s23 = sshll.u32 %s148_s22, 4  ;;  %s145_s18 = scalar_lea.sflag [#allocation3], %s144_s4  ;;  %s157_s23 = int_to_ptr.vmem [resolvable:$true] %s156_s23 }
  0x27   : > { %p424_p2 = pneg %p652_p11  ;;  %s435_s27 = scalar_lea.vmem %s157_s23, 128 }
  0x28   : > { %p436_p12 = scmp.ne.s32.totalorder %s157_s23, %s435_s27  ;;  %s537_s26 = smov [#allocation2]  }
  0x29   : > { %s440_s28 = sshll.u32 %s537_s26, 4  ;;  %s441_s28 = int_to_ptr.vmem [resolvable:$false] %s440_s28 }
  0x2a   : > { %p438_p3 = pnand %p436_p12, %p424_p2  ;;  %s442_s29 = scalar_lea.vmem %s441_s28, 256 }
  0x2b   : > { %p443_p7 = scmp.lt.s32.totalorder %s157_s23, %s441_s28  ;;  %p444_p6 = scmp.lt.s32.totalorder %s442_s29, %s435_s27 }
  0x2c   : > { %p439_p5 = pneg %p438_p3 }
  0x2d   : > { %p445_p4 = por %p444_p6, %p443_p7 }
  0x2f   : > { %p446_p10 = pnand %p445_p4, %p439_p5 }
  0x31   : > { %449 = shalt.err (!%p446_p10)
}
  0x32   : > { %338 = dma.hbm_to_vmem [thread:$0]  (!%p652_p11), %s154_s16, 128, %s157_s23, %s145_s18  }
  0x33   : > { %165 = sbr.rel (%p608_p8) target bundleno = 83 (0x53), region = 28  ;;  %s663_s30 = sand.u32 (!%p608_p8), 1, %s518_s10  }
  0x34   : > { %s316_s4 = sshll.u32 (!%p608_p8), %s663_s30, 3  ;;  %s168_s6 = scalar_lea.sflag (!%p608_p8), [#allocation3], %s663_s30 }
  0x35   : > { %s171_s7 = scalar_lea.vmem (!%p608_p8), [#allocation2], %s316_s4  ;;  %p727_p9 = scmp.ne.s32.totalorder (!%p608_p8), %s721_s19, 0 }
  0x38   : > { %501 = dma.done.wait (%p727_p9), %s168_s6, 128  }
  0x39   : > { %503 = vsyncadd (%p727_p9), %s168_s6, 4294967168 }
  0x3a   : > { %505 = dma.done.wait (%p588_p1), [#allocation6], 128  }
  0x3b   : > { %507 = vsyncadd (%p588_p1), [#allocation6], 4294967168  ;;  %s195_s21 = scalar_lea.vmem [#allocation7], %s316_s4  ;;  %s320_s15 = sshll.u32 %s526_s12, 7  ;;  %v196_v0 = vld [vmem:[%s171_s7] sm:$0xff]  ;;  %v197_v1 = vld [vmem:[#allocation5] sm:$0xff] }
  0x3c   : > { %s216_s8 = sshll.u32 %s195_s21, 4  ;;  %vm199_vm0 = vcmask 261120   ;;  %v198_v2 = vadd.f32 %v197_v1, %v196_v0  ;;  %s214_s22 = scalar_lea.hbm %s717_s2, %s320_s15  ;;  %s217_s8 = int_to_ptr.vmem [resolvable:$true] %s216_s8 }
  0x3d   : > { %s202_s23 = scalar_lea.sflag [#allocation4], %s663_s30  ;;  %s450_s24 = scalar_lea.vmem %s217_s8, 128 }
  0x3e   : > { %200 = vst.msk [vmem:[%s195_s21] sm:$0xff] %vm199_vm0, %v198_v2  ;;  %p451_p8 = scmp.ne.s32.totalorder %s217_s8, %s450_s24  ;;  %s538_s17 = smov [#allocation7]  }
  0x3f   : > { %s454_s18 = sshll.u32 %s538_s17, 4  ;;  %s455_s18 = int_to_ptr.vmem [resolvable:$false] %s454_s18 }
  0x40   : > { %p452_p1 = pnand %p451_p8, %p640_p0  ;;  %s456_s12 = scalar_lea.vmem %s455_s18, 256 }
  0x41   : > { %p457_p11 = scmp.lt.s32.totalorder %s217_s8, %s455_s18  ;;  %p458_p2 = scmp.lt.s32.totalorder %s456_s12, %s450_s24 }
  0x42   : > { %p453_p13 = pneg %p452_p1 }
  0x43   : > { %p459_p12 = por %p458_p2, %p457_p11 }
  0x45   : > { %p460_p3 = pnand %p459_p12, %p453_p13 }
  0x47   : > { %463 = shalt.err (!%p460_p3)
}
  0x48   : > { %s464_s27 = scalar_lea.hbm %s214_s22, 128  ;;  %s468_s29 = scalar_lea.hbm %s717_s2, 256 }
  0x49   : > { %p465_p5 = scmp.ne.s32.totalorder %s214_s22, %s464_s27  ;;  %p469_p4 = scmp.lt.s32.totalorder %s214_s22, %s717_s2 }
  0x4a   : > { %p470_p10 = scmp.lt.s32.totalorder %s468_s29, %s464_s27 }
  0x4b   : > { %p466_p7 = pnand %p465_p5, %p640_p0 }
  0x4c   : > { %p471_p9 = por %p470_p10, %p469_p4 }
  0x4d   : > { %p467_p6 = pneg %p466_p7 }
  0x4f   : > { %p472_p8 = pnand %p471_p9, %p467_p6 }
  0x51   : > { %475 = shalt.err (!%p472_p8)
}
  0x52   : > { %329 = dma.vmem_to_hbm [thread:$0]  (%p640_p0), %s217_s8, 128, %s214_s22, %s202_s23  }
  0x53 PF: > { %s228_s6 = sand.u32 1, %s514_s9   ;;  %p728_p1 = scmp.ne.s32.totalorder %s722_s20, 0 }
  0x54   : > { %p729_p13 = scmp.ge.s32.totalorder %s534_s14, 2  ;;  %s229_s7 = scalar_lea.sflag [#allocation4], %s228_s6 }
  0x56   : > { %p340_p11 = pnand %p729_p13, %p728_p1 }
  0x58   : > { %p341_p2 = pneg %p340_p11 }
  0x5a   : > { %509 = dma.done.wait (%p341_p2), %s229_s7, 128  }
  0x5b   : > { %511 = vsyncadd (%p341_p2), %s229_s7, 4294967168  ;;  %s19_s14 = sadd.s32 1, %s534_s14   ;;  %s730_s9 = smov %s518_s10 }
  0x5c   : > { %p16_p12 = scmp.ge.s32.totalorder %s19_s14, 4   ;;  %s731_s10 = smov %s522_s11 }
  0x5d   : > { %s732_s11 = smov %s646_s5  ;;  %s733_s12 = smov %s530_s13 }
  0x5e   : > { %s734_s13 = smov %s736_s25  ;;  %18 = sbr.rel (!%p16_p12) target bundleno = 7 (0x7), region = 78 }
  0x63   :  { %234 = vsyncpa [#allocation3], 1 }
  0x64   :  { %236 = vsyncpa [#allocation3 + $0x1], 1 }
  0x65   :  { %237 = vsyncpa [#allocation6], 1 }
  0x66   :  { %238 = vsyncpa [#allocation4], 1 }
  0x67   :  { %240 = vsyncpa [#allocation4 + $0x1], 1 }

</bundles_post_ra>
